<compile_context>
chip_gen: v7x
topology: tpu7x:2x2x1
jax: 0.10.0
libtpu: 0.0.40
codegen_flags: <defaults>
</compile_context>

<pallas_src>
import functools

import jax
import jax.numpy as jnp
from jax import lax
from jax.experimental import pallas as pl
from jax.experimental.pallas import tpu as pltpu


def _round_up(n, m):
    return ((n + m - 1) // m) * m


def _choose_tile_n(n, tile_n):
    """Lane tile: full dim for small N; else a multiple of 128 that keeps at
    least 2 n-steps (DMA overlap + megacore sharding), capped by tile_n."""
    if n <= 128:
        return n
    tn = min(_round_up(tile_n, 128), _round_up(pl.cdiv(n, 2), 128))
    return max(tn, 128)


def _vmem_limit_bytes(required_bytes):
    """Generation-aware VMEM budget: ~2x the actual need, floored at 32 MiB,
    capped at 3/4 of the chip's physical VMEM (v5e/v6e 128 MiB, v7x 64 MiB)."""
    try:
        cap = int(pltpu.get_tpu_info().vmem_capacity_bytes)
    except Exception:  # conservative (v7x-safe) fallback
        cap = 64 * 1024 * 1024
    return int(min(max(2 * required_bytes, 32 * 1024 * 1024), (cap * 3) // 4))


# ---------------------------------------------------------------------------
# Fused Pallas kernel: all ConvBNReLURes1D blocks on one resident tile
# ---------------------------------------------------------------------------
def _fused_blocks_kernel(x_ref, w1_ref, b1_ref, w2_ref, b2_ref, o_ref, *,
                         mxu_bf16):
    # x_ref block: (1, C, TN).  Weight refs hold ALL blocks, resident in VMEM.
    y0 = x_ref[0].astype(jnp.float32)                      # (C, TN) f32 compute
    n_blocks = w1_ref.shape[0]

    def one_block(blk, y):
        w1 = w1_ref[blk]                                   # (Ch, C)
        b1 = b1_ref[blk]                                   # (Ch, 1)
        w2 = w2_ref[blk]                                   # (C, Ch)
        b2 = b2_ref[blk]                                   # (C, 1)
        lhs = y.astype(jnp.bfloat16) if mxu_bf16 else y
        # net1: Conv1d(k=1) + folded BN + ReLU
        h = jnp.maximum(
            jnp.dot(w1, lhs, preferred_element_type=jnp.float32) + b1, 0.0)
        hh = h.astype(jnp.bfloat16) if mxu_bf16 else h
        # net2: Conv1d(k=1) + folded BN, then residual add + outer ReLU
        z = jnp.dot(w2, hh, preferred_element_type=jnp.float32) + b2
        return jnp.maximum(z + y, 0.0)

    y = lax.fori_loop(0, n_blocks, one_block, y0, unroll=(n_blocks <= 4))
    o_ref[0] = y.astype(o_ref.dtype)


@functools.partial(jax.jit, static_argnames=("tile_n",))
def conv_bn_relu_res1d_forward(x, params, *, tile_n=1024):
    """x: (B, C, N) channels-first (f32 or bf16). Returns (B, C, N) in x.dtype."""
    w1s, b1s, w2s, b2s = params["w1"], params["b1"], params["w2"], params["b2"]
    B, C, N = x.shape
    blocks, Ch, _ = w1s.shape

    TN = _choose_tile_n(N, tile_n)
    grid = (B, pl.cdiv(N, TN))

    # bf16 MXU operands once both contraction dims are MXU-sized.
    mxu_bf16 = bool(C >= 128 and Ch >= 128)
    if mxu_bf16:
        w1s = w1s.astype(jnp.bfloat16)
        w2s = w2s.astype(jnp.bfloat16)

    w_bytes = sum(int(a.size) * a.dtype.itemsize for a in (w1s, b1s, w2s, b2s))
    act_block_bytes = C * TN * x.dtype.itemsize

    # Constant-index weight stacks are DMA'd once and revisited: single-buffer
    # them once they're big enough to matter (v7x has only 64 MiB VMEM).
    single_buffer_weights = w_bytes >= (4 << 20)
    wspec_kwargs = ({"pipeline_mode": pl.Buffered(1)}
                    if single_buffer_weights else {})

    scratch_f32_bytes = 4 * TN * (C + Ch)                   # live y + h (f32)
    required = (4 * act_block_bytes                         # x/out double-buffered
                + (1 if single_buffer_weights else 2) * w_bytes
                + 2 * scratch_f32_bytes)

    n_eff = grid[1] * TN                                    # includes ragged tile
    cost = pl.CostEstimate(
        flops=4 * blocks * B * n_eff * C * Ch,              # two matmuls / block
        transcendentals=0,
        bytes_accessed=2 * B * C * N * x.dtype.itemsize + w_bytes)

    kernel = functools.partial(_fused_blocks_kernel, mxu_bf16=mxu_bf16)

    return pl.pallas_call(
        kernel,
        out_shape=jax.ShapeDtypeStruct((B, C, N), x.dtype),
        grid_spec=pl.GridSpec(
            grid=grid,
            in_specs=[
                pl.BlockSpec((1, C, TN), lambda b, n: (b, 0, n)),        # x tile
                # Full weight/bias stacks, constant index -> loaded once, resident.
                pl.BlockSpec((blocks, Ch, C), lambda b, n: (0, 0, 0), **wspec_kwargs),
                pl.BlockSpec((blocks, Ch, 1), lambda b, n: (0, 0, 0), **wspec_kwargs),
                pl.BlockSpec((blocks, C, Ch), lambda b, n: (0, 0, 0), **wspec_kwargs),
                pl.BlockSpec((blocks, C, 1), lambda b, n: (0, 0, 0), **wspec_kwargs),
            ],
            out_specs=pl.BlockSpec((1, C, TN), lambda b, n: (b, 0, n)),
        ),
        compiler_params=pltpu.CompilerParams(
            dimension_semantics=("parallel", "parallel"),
            vmem_limit_bytes=_vmem_limit_bytes(required),
        ),
        cost_estimate=cost,
    )(x, w1s, b1s, w2s, b2s)


# ---------------------------------------------------------------------------
# Parameter construction (deterministic, synthetic) + BN folding (eval mode)
# ---------------------------------------------------------------------------
def _fold_bn(w, b, gamma, beta, mean, var, eps=1e-5):
    """Fold eval-mode BatchNorm1d into a preceding 1x1 conv.

    w: (Cout, Cin) left-matmul conv weight, b: (Cout,).
    Returns (w', b') with  BN(W @ x + b) == W' @ x + b'.
    """
    scale = gamma / jnp.sqrt(var + eps)            # (Cout,)
    shift = beta - mean * scale
    return w * scale[:, None], b * scale + shift


def make_params(key, channels, blocks=1, res_expansion=1.0):
    """Deterministic synthetic params for `blocks` stacked ConvBNReLURes1D."""
    ch = int(channels * res_expansion)
    w1s, b1s, w2s, b2s = [], [], [], []
    for blk in range(blocks):
        keys = jax.random.split(jax.random.fold_in(key, blk), 4)
        # Conv1d weights (kernel_size=1) in PyTorch (Cout, Cin) layout.
        w1 = jax.random.normal(keys[0], (ch, channels), jnp.float32) * 0.2
        b1 = jax.random.normal(keys[1], (ch,), jnp.float32) * 0.1
        w2 = jax.random.normal(keys[2], (channels, ch), jnp.float32) * 0.2
        b2 = jax.random.normal(keys[3], (channels,), jnp.float32) * 0.1
        # BatchNorm running stats (eval mode), deterministic and non-trivial.
        g1 = 1.0 + 0.05 * jnp.arange(ch, dtype=jnp.float32)
        be1 = 0.02 * jnp.arange(ch, dtype=jnp.float32)
        m1 = 0.01 * jnp.arange(ch, dtype=jnp.float32)
        v1 = 1.0 + 0.03 * jnp.arange(ch, dtype=jnp.float32)
        g2 = 1.0 + 0.04 * jnp.arange(channels, dtype=jnp.float32)
        be2 = -0.01 * jnp.arange(channels, dtype=jnp.float32)
        m2 = 0.02 * jnp.arange(channels, dtype=jnp.float32)
        v2 = 1.0 + 0.02 * jnp.arange(channels, dtype=jnp.float32)
        # TODO(synk): training-mode BatchNorm (batch statistics) is not folded;
        # eval-mode (running-stats) semantics are used here.
        w1f, b1f = _fold_bn(w1, b1, g1, be1, m1, v1)
        w2f, b2f = _fold_bn(w2, b2, g2, be2, m2, v2)
        w1s.append(w1f); b1s.append(b1f[:, None])
        w2s.append(w2f); b2s.append(b2f[:, None])
    return {"w1": jnp.stack(w1s), "b1": jnp.stack(b1s),
            "w2": jnp.stack(w2s), "b2": jnp.stack(b2s)}


# ---------------------------------------------------------------------------
# Pure-JAX reference (channels-first) for correctness check
# ---------------------------------------------------------------------------
def conv_bn_relu_res1d_ref(x, params):
    w1s, b1s, w2s, b2s = params["w1"], params["b1"], params["w2"], params["b2"]
    y = x
    for blk in range(w1s.shape[0]):
        h = jnp.maximum(
            jnp.einsum("oc,bcn->bon", w1s[blk], y) + b1s[blk][None], 0.0)
        y = jnp.maximum(
            jnp.einsum("co,bon->bcn", w2s[blk], h) + b2s[blk][None] + y, 0.0)
    return y


if __name__ == "__main__":
    key = jax.random.PRNGKey(0)
    k_x, k_p = jax.random.split(key)

    B, C, N = 2, 16, 32          # (batch, channels, points), channels-first
    blocks = 2                   # two stacked ConvBNReLURes1D blocks, fused

    params = make_params(k_p, channels=C, blocks=blocks, res_expansion=1.0)

    # f32 activation I/O (tight correctness check; no pad / slice in wrapper).
    x = jax.random.normal(k_x, (B, C, N), jnp.float32)
    out = jax.block_until_ready(conv_bn_relu_res1d_forward(x, params))
    ref = conv_bn_relu_res1d_ref(x, params)
    assert out.shape == (B, C, N)
    assert jnp.allclose(out, ref, atol=1e-4, rtol=1e-4), "f32 mismatch vs reference"

    # bf16 activation I/O (halves activation HBM bytes; compute stays f32).
    x_bf16 = x.astype(jnp.bfloat16)
    out_bf16 = jax.block_until_ready(conv_bn_relu_res1d_forward(x_bf16, params))
    ref_bf16 = conv_bn_relu_res1d_ref(x_bf16.astype(jnp.float32), params)
    assert out_bf16.dtype == jnp.bfloat16
    assert jnp.allclose(out_bf16.astype(jnp.float32), ref_bf16,
                        atol=5e-2, rtol=5e-2), "bf16 mismatch vs reference"

    print("KERNEL_OK")
</pallas_src>

<mosaic_0001>
module attributes {stable_mosaic.version = 11 : i64} {
  func.func @_fused_blocks_kernel(%arg0: i32, %arg1: i32, %arg2: memref<1x16x32xf32, #tpu.memory_space<vmem>>, %arg3: memref<2x16x16xf32, #tpu.memory_space<vmem>>, %arg4: memref<2x16x1xf32, #tpu.memory_space<vmem>>, %arg5: memref<2x16x16xf32, #tpu.memory_space<vmem>>, %arg6: memref<2x16x1xf32, #tpu.memory_space<vmem>>, %arg7: memref<1x16x32xf32, #tpu.memory_space<vmem>>) attributes {dimension_semantics = [#tpu.dimension_semantics<parallel>, #tpu.dimension_semantics<parallel>], iteration_bounds = array<i64: 2, 1>, scalar_prefetch = 0 : i64, scratch_operands = 0 : i64, tpu.core_type = #tpu.core_type<tc>, window_params = [{transform_indices = @transform_0, window_bounds = array<i64: 1, 16, 32>}, {pipeline_mode = #tpu.pipeline_mode<synchronous>, transform_indices = @transform_1, window_bounds = array<i64: 2, 16, 16>}, {pipeline_mode = #tpu.pipeline_mode<synchronous>, transform_indices = @transform_2, window_bounds = array<i64: 2, 16, 1>}, {pipeline_mode = #tpu.pipeline_mode<synchronous>, transform_indices = @transform_3, window_bounds = array<i64: 2, 16, 16>}, {pipeline_mode = #tpu.pipeline_mode<synchronous>, transform_indices = @transform_4, window_bounds = array<i64: 2, 16, 1>}, {transform_indices = @transform_5, window_bounds = array<i64: 1, 16, 32>}]} {
    %c0 = arith.constant 0 : index
    %c0_0 = arith.constant 0 : index
    %c0_1 = arith.constant 0 : index
    %0 = vector.load %arg2[%c0, %c0_0, %c0_1] : memref<1x16x32xf32, #tpu.memory_space<vmem>>, vector<1x16x32xf32>
    %1 = vector.shape_cast %0 : vector<1x16x32xf32> to vector<16x32xf32>
    %c0_i32 = arith.constant 0 : i32
    %2 = arith.index_cast %c0_i32 : i32 to index
    %c0_2 = arith.constant 0 : index
    %c0_3 = arith.constant 0 : index
    %3 = vector.load %arg3[%2, %c0_2, %c0_3] : memref<2x16x16xf32, #tpu.memory_space<vmem>>, vector<1x16x16xf32>
    %4 = vector.shape_cast %3 : vector<1x16x16xf32> to vector<16x16xf32>
    %5 = arith.index_cast %c0_i32 : i32 to index
    %c0_4 = arith.constant 0 : index
    %c0_5 = arith.constant 0 : index
    %6 = vector.load %arg4[%5, %c0_4, %c0_5] : memref<2x16x1xf32, #tpu.memory_space<vmem>>, vector<1x16x1xf32>
    %7 = vector.shape_cast %6 : vector<1x16x1xf32> to vector<16x1xf32>
    %8 = arith.index_cast %c0_i32 : i32 to index
    %c0_6 = arith.constant 0 : index
    %c0_7 = arith.constant 0 : index
    %9 = vector.load %arg5[%8, %c0_6, %c0_7] : memref<2x16x16xf32, #tpu.memory_space<vmem>>, vector<1x16x16xf32>
    %10 = vector.shape_cast %9 : vector<1x16x16xf32> to vector<16x16xf32>
    %11 = arith.index_cast %c0_i32 : i32 to index
    %c0_8 = arith.constant 0 : index
    %c0_9 = arith.constant 0 : index
    %12 = vector.load %arg6[%11, %c0_8, %c0_9] : memref<2x16x1xf32, #tpu.memory_space<vmem>>, vector<1x16x1xf32>
    %13 = vector.shape_cast %12 : vector<1x16x1xf32> to vector<16x1xf32>
    %cst = arith.constant dense<0.000000e+00> : vector<16x32xf32>
    %14 = tpu.matmul %4, %1, %cst {dimension_numbers = #tpu.dot_dimension_numbers<[1], [0], [0], [1], [0, 0, 1, 1], [], []>} : vector<16x16xf32>, vector<16x32xf32>, vector<16x32xf32> -> vector<16x32xf32>
    %15 = vector.broadcast %7 : vector<16x1xf32> to vector<16x32xf32>
    %16 = arith.addf %14, %15 : vector<16x32xf32>
    %cst_10 = arith.constant 0.000000e+00 : f32
    %17 = vector.broadcast %cst_10 : f32 to vector<16x32xf32>
    %18 = arith.maximumf %16, %17 : vector<16x32xf32>
    %cst_11 = arith.constant dense<0.000000e+00> : vector<16x32xf32>
    %19 = tpu.matmul %10, %18, %cst_11 {dimension_numbers = #tpu.dot_dimension_numbers<[1], [0], [0], [1], [0, 0, 1, 1], [], []>} : vector<16x16xf32>, vector<16x32xf32>, vector<16x32xf32> -> vector<16x32xf32>
    %20 = vector.broadcast %13 : vector<16x1xf32> to vector<16x32xf32>
    %21 = arith.addf %19, %20 : vector<16x32xf32>
    %22 = arith.addf %21, %1 : vector<16x32xf32>
    %cst_12 = arith.constant 0.000000e+00 : f32
    %23 = vector.broadcast %cst_12 : f32 to vector<16x32xf32>
    %24 = arith.maximumf %22, %23 : vector<16x32xf32>
    %c1_i32 = arith.constant 1 : i32
    %25 = arith.index_cast %c1_i32 : i32 to index
    %c0_13 = arith.constant 0 : index
    %c0_14 = arith.constant 0 : index
    %26 = vector.load %arg3[%25, %c0_13, %c0_14] : memref<2x16x16xf32, #tpu.memory_space<vmem>>, vector<1x16x16xf32>
    %27 = vector.shape_cast %26 : vector<1x16x16xf32> to vector<16x16xf32>
    %28 = arith.index_cast %c1_i32 : i32 to index
    %c0_15 = arith.constant 0 : index
    %c0_16 = arith.constant 0 : index
    %29 = vector.load %arg4[%28, %c0_15, %c0_16] : memref<2x16x1xf32, #tpu.memory_space<vmem>>, vector<1x16x1xf32>
    %30 = vector.shape_cast %29 : vector<1x16x1xf32> to vector<16x1xf32>
    %31 = arith.index_cast %c1_i32 : i32 to index
    %c0_17 = arith.constant 0 : index
    %c0_18 = arith.constant 0 : index
    %32 = vector.load %arg5[%31, %c0_17, %c0_18] : memref<2x16x16xf32, #tpu.memory_space<vmem>>, vector<1x16x16xf32>
    %33 = vector.shape_cast %32 : vector<1x16x16xf32> to vector<16x16xf32>
    %34 = arith.index_cast %c1_i32 : i32 to index
    %c0_19 = arith.constant 0 : index
    %c0_20 = arith.constant 0 : index
    %35 = vector.load %arg6[%34, %c0_19, %c0_20] : memref<2x16x1xf32, #tpu.memory_space<vmem>>, vector<1x16x1xf32>
    %36 = vector.shape_cast %35 : vector<1x16x1xf32> to vector<16x1xf32>
    %cst_21 = arith.constant dense<0.000000e+00> : vector<16x32xf32>
    %37 = tpu.matmul %27, %24, %cst_21 {dimension_numbers = #tpu.dot_dimension_numbers<[1], [0], [0], [1], [0, 0, 1, 1], [], []>} : vector<16x16xf32>, vector<16x32xf32>, vector<16x32xf32> -> vector<16x32xf32>
    %38 = vector.broadcast %30 : vector<16x1xf32> to vector<16x32xf32>
    %39 = arith.addf %37, %38 : vector<16x32xf32>
    %cst_22 = arith.constant 0.000000e+00 : f32
    %40 = vector.broadcast %cst_22 : f32 to vector<16x32xf32>
    %41 = arith.maximumf %39, %40 : vector<16x32xf32>
    %cst_23 = arith.constant dense<0.000000e+00> : vector<16x32xf32>
    %42 = tpu.matmul %33, %41, %cst_23 {dimension_numbers = #tpu.dot_dimension_numbers<[1], [0], [0], [1], [0, 0, 1, 1], [], []>} : vector<16x16xf32>, vector<16x32xf32>, vector<16x32xf32> -> vector<16x32xf32>
    %43 = vector.broadcast %36 : vector<16x1xf32> to vector<16x32xf32>
    %44 = arith.addf %42, %43 : vector<16x32xf32>
    %45 = arith.addf %44, %24 : vector<16x32xf32>
    %cst_24 = arith.constant 0.000000e+00 : f32
    %46 = vector.broadcast %cst_24 : f32 to vector<16x32xf32>
    %47 = arith.maximumf %45, %46 : vector<16x32xf32>
    %c2_i32 = arith.constant 2 : i32
    %c0_25 = arith.constant 0 : index
    %c0_26 = arith.constant 0 : index
    %c0_27 = arith.constant 0 : index
    %48 = vector.load %arg7[%c0_25, %c0_26, %c0_27] : memref<1x16x32xf32, #tpu.memory_space<vmem>>, vector<1x16x32xf32>
    %49 = vector.shape_cast %48 : vector<1x16x32xf32> to vector<16x32xf32>
    %50 = vector.shape_cast %47 : vector<16x32xf32> to vector<1x16x32xf32>
    tpu.vector_store %arg7[%c0_25, %c0_26, %c0_27], %50 {strides = array<i32>} : memref<1x16x32xf32, #tpu.memory_space<vmem>>, vector<1x16x32xf32>,
    return
  }
  func.func @transform_0(%arg0: i32, %arg1: i32) -> (i32, i32, i32) {
    %c0_i32 = arith.constant 0 : i32
    %c0_i32_0 = arith.constant 0 : i32
    return %arg0, %c0_i32, %arg1 : i32, i32, i32
  }
  func.func @transform_1(%arg0: i32, %arg1: i32) -> (i32, i32, i32) {
    %c0_i32 = arith.constant 0 : i32
    %c0_i32_0 = arith.constant 0 : i32
    %c0_i32_1 = arith.constant 0 : i32
    %c0_i32_2 = arith.constant 0 : i32
    return %c0_i32, %c0_i32_0, %c0_i32_1 : i32, i32, i32
  }
  func.func @transform_2(%arg0: i32, %arg1: i32) -> (i32, i32, i32) {
    %c0_i32 = arith.constant 0 : i32
    %c0_i32_0 = arith.constant 0 : i32
    %c0_i32_1 = arith.constant 0 : i32
    %c0_i32_2 = arith.constant 0 : i32
    return %c0_i32, %c0_i32_0, %c0_i32_1 : i32, i32, i32
  }
  func.func @transform_3(%arg0: i32, %arg1: i32) -> (i32, i32, i32) {
    %c0_i32 = arith.constant 0 : i32
    %c0_i32_0 = arith.constant 0 : i32
    %c0_i32_1 = arith.constant 0 : i32
    %c0_i32_2 = arith.constant 0 : i32
    return %c0_i32, %c0_i32_0, %c0_i32_1 : i32, i32, i32
  }
  func.func @transform_4(%arg0: i32, %arg1: i32) -> (i32, i32, i32) {
    %c0_i32 = arith.constant 0 : i32
    %c0_i32_0 = arith.constant 0 : i32
    %c0_i32_1 = arith.constant 0 : i32
    %c0_i32_2 = arith.constant 0 : i32
    return %c0_i32, %c0_i32_0, %c0_i32_1 : i32, i32, i32
  }
  func.func @transform_5(%arg0: i32, %arg1: i32) -> (i32, i32, i32) {
    %c0_i32 = arith.constant 0 : i32
    %c0_i32_0 = arith.constant 0 : i32
    return %arg0, %c0_i32, %arg1 : i32, i32, i32
  }
}

</mosaic_0001>

<bundles_post_ra>
// kernel: conv_bn_relu_res1d_forward.1
= control target key start
LH: loop header
LB: loop body
LE: loop exit
PB: predicated region body
PF: predicated region fallthrough
CT: control target
= control target key end

     0   :  { %10 = vsyncpa [#allocation3], 0  ;;  %s1280_s0 = inlined_call_operand.vmem [shape: f32[2,16,32], index: 0, kind: input, shape index: {}]   ;;  %s1281_s1 = inlined_call_operand.vmem [shape: f32[2,16,16], index: 1, kind: input, shape index: {}]   ;;  %s1282_s2 = inlined_call_operand.vmem [shape: f32[2,16,1], index: 2, kind: input, shape index: {}]   ;;  %s1283_s3 = inlined_call_operand.hbm [shape: f32[2,16,16], index: 3, kind: input, shape index: {}]   ;;  %s1284_s4 = inlined_call_operand.vmem [shape: f32[2,16,1], index: 4, kind: input, shape index: {}]   ;;  %s1285_s5 = inlined_call_operand.hbm [shape: f32[2,16,32], index: 5, kind: output, shape index: {}]  }
   0x1   :  { %11 = vsyncpa [#allocation4], 0 }
   0x2   :  { %13 = vsyncpa [#allocation4 + $0x1], 0  ;;  %s1083_s18 = smov 0   ;;  %s1085_s19 = smov 0  }
   0x3   :  { %s1087_s20 = smov 0   ;;  %s1089_s21 = smov 0  }
   0x4   :  { %s1091_s22 = smov 0   ;;  %s1093_s23 = smov 0  }
   0x5 LB: > { %s770_s24 = sadd.s32 4294967295, %s1044_s23   ;;  %s771_s25 = sadd.s32 4294967294, %s1044_s23   ;;  %s1044_s23 = sphi %s1093_s23, %s19_s23   ;;  %s1040_s22 = sphi %s1091_s22, %s1303_s22   ;;  %s1036_s21 = sphi %s1089_s21, %s1302_s21   ;;  %s1032_s20 = sphi %s1087_s20, %s1301_s20   ;;  %s1028_s19 = sphi %s1085_s19, %s1300_s19   ;;  %s1024_s18 = sphi %s1083_s18, %s1299_s18  }
   0x6   : > { %s31_s26 = sadd.s32 1, %s1040_s22  ;;  %s152_s27 = sadd.s32 1, %s1032_s20 }
   0x7   : > { %p33_p0 = scmp.ge.s32.totalorder %s31_s26, 2  ;;  %p162_p1 = scmp.ne.s32.totalorder %s1032_s20, %s1028_s19 }
   0x8   : > { %p163_p2 = scmp.eq.s32.totalorder %s770_s24, 1  ;;  %p168_p3 = scmp.ne.s32.totalorder %s1028_s19, %s1024_s18 }
   0x9   : > { %s1305_s26 = smov (%p33_p0, %s31_s26), 0  ;;  %p169_p5 = scmp.eq.s32.totalorder %s771_s25, 1 }
   0xa   : > { %p1123_p4 = por %p163_p2, %p162_p1  ;;  %s147_s29 = ssub.s32 %s1040_s22, %s1305_s26 }
   0xb   : > { %p772_p6 = scmp.ge.s32.totalorder %s1044_s23, 1  ;;  %p150_p7 = scmp.eq.s32.totalorder %s147_s29, 0 }
   0xc   : > { %s1290_s28 = scalar_select %p1123_p4, 1, 0 }
   0xd   : > { %p1130_p8 = por %p169_p5, %p168_p3  ;;  %p176_p9 = scmp.lt.s32.totalorder %s1044_s23, 3 }
   0xe   : > { %s1136_s6 = scalar_select %p150_p7, %s1032_s20, %s152_s27  }
   0xf   : > { %s1291_s30 = scalar_select %p1130_p8, 1, 0 }
  0x10   : > { %p1138_p10 = pnand %p772_p6, %p176_p9  ;;  %p1142_p11 = scmp.eq.s32.totalorder %s770_s24, 0 }
  0x11   : > { %s1046_s9 = smov [#allocation2]   ;;  %s934_s14 = scalar_lea.hbm %s1283_s3, 512 }
  0x12   : > { %s1292_s7 = scalar_select %p1138_p10, 1, 0 }
  0x13   : > { %s1293_s8 = scalar_select %p1142_p11, 1, 0 }
  0x14   : > { %p867_p12 = pneg %p1138_p10  ;;  %s194_s10 = sshll.u32 %s1046_s9, 4  ;;  %s195_s10 = int_to_ptr.vmem [resolvable:$true] %s194_s10 }
  0x15   : > { %p935_p0 = scmp.ne.s32.totalorder %s1283_s3, %s934_s14  ;;  %p941_p5 = scmp.lt.u32.totalorder %s934_s14, %s1283_s3 }
  0x16   : > { %p1150_p13 = pnand %p1142_p11, %p867_p12 }
  0x18   : > { %p936_p1 = pneg %p1150_p13 }
  0x1a   : > { %p937_p2 = pnand %p936_p1, %p935_p0 }
  0x1c   : > { %p938_p3 = pneg %p937_p2 }
  0x1e   : > { %p943_p6 = pnand %p941_p5, %p938_p3 }
  0x20   : > { %946 = shalt.err (!%p943_p6)
}
  0x21   : > { %s947_s25 = scalar_lea.vmem %s195_s10, 512  ;;  %p955_p8 = scmp.lt.s32.totalorder %s195_s10, %s195_s10 }
  0x22   : > { %p948_p7 = scmp.ne.s32.totalorder %s195_s10, %s947_s25  ;;  %p956_p4 = scmp.lt.s32.totalorder %s947_s25, %s947_s25 }
  0x24   : > { %p950_p9 = pnand %p948_p7, %p936_p1  ;;  %p957_p11 = por %p956_p4, %p955_p8 }
  0x26   : > { %p951_p12 = pneg %p950_p9 }
  0x28   : > { %p958_p10 = pnand %p957_p11, %p951_p12 }
  0x2a   : > { %961 = shalt.err (!%p958_p10)
}
  0x2b   : > { %s1047_s27 = smov 128   ;;  %s1048_s29 = smov 8  }
  0x2c   : > { %870 = dma.hbm_to_vmem [thread:$0]  (!%p1150_p13), %s1283_s3, 512, %s195_s10, [#allocation3], %s1047_s27, %s1047_s27, %s1048_s29  }
  0x2d   : > { %p1295_p0 = scmp.ne.s32.totalorder %s1292_s7, 0 }
  0x2e   : > { %p1296_p2 = scmp.ne.s32.totalorder (!%p1295_p0), %s1293_s8, 0 }
  0x2f   : > { %224 = sbr.rel (%p1295_p0) target bundleno = 973 (0x3cd), region = 40 }
  0x36   : > { %1015 = dma.done.wait (%p1296_p2), [#allocation3], 512  }
  0x37   : > { %1017 = vsyncadd (%p1296_p2), [#allocation3], 4294966784  ;;  %p255_p4 = scmp.lt.s32.totalorder %s1036_s21, 1  ;;  %v1049_v0 = vmov 0   ;;  %vm283_vm0 = vcmask 130048   ;;  %v265_v3 = vld [vmem:[%s1281_s1] sm:$0xff] }
  0x38   : > { %932 = vset.pattern.permute.xlu0 %v1049_v0  ;;  %933 = vset.pattern.permute.xlu1 %v1049_v0  ;;  %v267_v5 = vld [vmem:[%s1282_s2] sm:$0xff]  ;;  %v268_v6 = vld [vmem:[%s1282_s2 + $0x8] sm:$0xff]  ;;  %v786_v8 = vld [vmem:[%s1282_s2 + $0x10] sm:$0xff]  ;;  %s252_s12 = sand.u32 1, %s1028_s19   ;;  %vm662_vm1 = vcmask 261120   ;;  %p1297_p10 = scmp.ne.s32.totalorder %s1290_s28, 0 }
  0x39   : > { %s256_s11 = scalar_select %p255_p4, %s1036_s21, 1  ;;  %821 = vmatprep.mubr.msk.f32.mxu0 %vm283_vm0, %v265_v3  ;;  %275 = vperm.xlu0 %932, %v267_v5   ;;  %v266_v7 = vld [vmem:[%s1281_s1 + $0x8] sm:$0xff]  ;;  %v788_v9 = vld [vmem:[%s1284_s4 + $0x10] sm:$0xff]  ;;  %v269_v10 = vld [vmem:[#allocation2] sm:$0xff] }
  0x3a   : > { %828 = vmatprep.mubr.msk.f32.mxu1 %vm283_vm0, %v269_v10  ;;  %v271_v11 = vld [vmem:[%s1284_s4] sm:$0xff]  ;;  %v272_v12 = vld [vmem:[%s1284_s4 + $0x8] sm:$0xff]  ;;  %v787_v13 = vld [vmem:[%s1282_s2 + $0x18] sm:$0xff]  ;;  %s1050_s17 = smov [#allocation5]  }
  0x3b   : > { %s799_s13 = sshll.u32 %s256_s11, 4  ;;  %369 = vperm.xlu1 %933, %v271_v11   ;;  %v789_v14 = vld [vmem:[%s1284_s4 + $0x18] sm:$0xff]  ;;  %v270_v24 = vld [vmem:[#allocation2 + $0x8] sm:$0xff]  ;;  %v784_v25 = vld [vmem:[%s1281_s1 + $0x10] sm:$0xff]  ;;  %s777_s11 = sshll.u32 %s252_s12, 4 }
  0x3c   : > { %s262_s10 = scalar_lea.vmem %s1280_s0, %s799_s13  ;;  %v785_v37 = vld [vmem:[%s1281_s1 + $0x18] sm:$0xff]  ;;  %v469_v38 = vld [vmem:[#allocation2 + $0x10] sm:$0xff]  ;;  %s800_s13 = sshll.u32 %s1036_s21, 8 }
  0x3d   : > { %v263_v1 = vld [vmem:[%s262_s10] sm:$0xff]  ;;  %v264_v2 = vld [vmem:[%s262_s10 + $0x8] sm:$0xff]  ;;  %280 = vperm.xlu0 %932, %v268_v6   ;;  %v470_v48 = vld [vmem:[#allocation2 + $0x18] sm:$0xff]  ;;  %s254_s14 = scalar_lea.vmem [#allocation5], %s777_s11  ;;  %s1230_s16 = scalar_lea.hbm %s1285_s5, %s800_s13 }
  0x3e   : > { %v845_v4 = vpack.c.bf16 %v264_v2, %v263_v1  ;;  %s680_s15 = sshll.u32 %s254_s14, 4  ;;  %s1234_s21 = scalar_lea.sflag [#allocation4], %s252_s12  ;;  %s1232_s15 = int_to_ptr.vmem [resolvable:$true] %s680_s15 }
  0x3f   : > { %374 = vperm.xlu1 %933, %v272_v12   ;;  %s962_s8 = scalar_lea.vmem %s1232_s15, 256  ;;  %s966_s24 = sshll.u32 %s1050_s17, 4  ;;  %s967_s24 = int_to_ptr.vmem [resolvable:$false] %s966_s24 }
  0x40   : > { %846 = vmatprep.subr.bf16.mxu0 %v845_v4  ;;  %p963_p8 = scmp.ne.s32.totalorder %s1232_s15, %s962_s8  ;;  %s968_s25 = scalar_lea.vmem %s967_s24, 512 }
  0x41   : > { %848 = vmatpush3.bf16.msra.mxu0 %v845_v4  ;;  %476 = vperm.xlu0 %932, %v786_v8   ;;  %p969_p1 = scmp.lt.s32.totalorder %s1232_s15, %s967_s24  ;;  %p970_p3 = scmp.lt.s32.totalorder %s968_s25, %s962_s8 }
  0x42   : > { %p964_p11 = pnand %p963_p8, %p1297_p10 }
  0x43   : > { %481 = vperm.xlu1 %933, %v787_v13   ;;  %p971_p5 = por %p970_p3, %p969_p1 }
  0x44   : > { %822 = vmatmul.mubr.msk.f32.vlgmr.msra.gmra.mrb[0].mxu0 %vm283_vm0, %v266_v7  ;;  %p965_p13 = pneg %p964_p11 }
  0x45   : > { %569 = vperm.xlu0 %932, %v788_v9   ;;  %835 = vmatprep.mubr.msk.f32.mxu0 %vm283_vm0, %v784_v25 }
  0x46   : > { %p972_p6 = pnand %p971_p5, %p965_p13 }
  0x47   : > { %574 = vperm.xlu1 %933, %v789_v14  }
  0xb8   : > { %v276_v15 = vpop.permute.xlu0 %275 }
  0xba   : > { %v370_v26 = vpop.permute.xlu1 %369 }
  0xbc   : > { %v281_v16 = vpop.permute.xlu0 %280 }
  0xbe   : > { %v375_v27 = vpop.permute.xlu1 %374 }
  0xc0   : > { %v477_v41 = vpop.permute.xlu0 %476 }
  0xc2   : > { %v482_v39 = vpop.permute.xlu1 %481 }
  0xc4   : > { %v570_v51 = vpop.permute.xlu0 %569 }
  0xc6   : > { %v575_v49 = vpop.permute.xlu1 %574 }
 0x117   : > { %v823_v17 = vpop.f32.mrb[0].mxu0 }
 0x118   : > { %v362_v18 = vadd.f32 %v823_v17, %v281_v16  ;;  %v356_v19 = vpop.f32.mrb[1].mxu0 }
 0x119   : > { %v357_v20 = vadd.f32 %v356_v19, %v276_v15 }
 0x11a   : > { %v366_v21 = vmax.f32 %v362_v18, 0.0 }
 0x11b   : > { %v365_v22 = vmax.f32 %v357_v20, 0.0 }
 0x11d   : > { %v849_v23 = vpack.c.bf16 %v366_v21, %v365_v22 }
 0x11f   : > { %850 = vmatprep.subr.bf16.mxu1 %v849_v23 }
 0x120   : > { %852 = vmatpush3.bf16.msra.mxu1 %v849_v23 }
 0x123   : > { %829 = vmatmul.mubr.msk.f32.vlgmr.msra.gmra.mrb[0].mxu1 %vm283_vm0, %v270_v24 }
 0x124   : > { %842 = vmatprep.mubr.msk.f32.mxu1 %vm283_vm0, %v469_v38 }
 0x1f6   : > { %v830_v28 = vpop.f32.mrb[0].mxu1 }
 0x1f7   : > { %v455_v29 = vadd.f32 %v830_v28, %v375_v27  ;;  %v449_v30 = vpop.f32.mrb[1].mxu1 }
 0x1f8   : > { %v450_v31 = vadd.f32 %v449_v30, %v370_v26 }
 0x1f9   : > { %v459_v32 = vadd.f32 %v455_v29, %v264_v2 }
 0x1fa   : > { %v458_v33 = vadd.f32 %v450_v31, %v263_v1 }
 0x1fb   : > { %v461_v34 = vmax.f32 %v459_v32, 0.0 }
 0x1fc   : > { %v460_v35 = vmax.f32 %v458_v33, 0.0 }
 0x1fe   : > { %v853_v36 = vpack.c.bf16 %v461_v34, %v460_v35 }
 0x200   : > { %854 = vmatprep.subr.bf16.mxu0 %v853_v36 }
 0x201   : > { %856 = vmatpush3.bf16.msra.mxu0 %v853_v36 }
 0x204   : > { %836 = vmatmul.mubr.msk.f32.vlgmr.msra.gmra.mrb[2].mxu0 %vm283_vm0, %v785_v37 }
 0x2d7   : > { %v837_v40 = vpop.f32.mrb[2].mxu0 }
 0x2d8   : > { %v562_v42 = vadd.f32 %v837_v40, %v482_v39  ;;  %v556_v43 = vpop.f32.mrb[3].mxu0 }
 0x2d9   : > { %v557_v44 = vadd.f32 %v556_v43, %v477_v41 }
 0x2da   : > { %v566_v45 = vmax.f32 %v562_v42, 0.0 }
 0x2db   : > { %v565_v46 = vmax.f32 %v557_v44, 0.0 }
 0x2dd   : > { %v857_v47 = vpack.c.bf16 %v566_v45, %v565_v46 }
 0x2df   : > { %858 = vmatprep.subr.bf16.mxu1 %v857_v47 }
 0x2e0   : > { %860 = vmatpush3.bf16.msra.mxu1 %v857_v47 }
 0x2e3   : > { %843 = vmatmul.mubr.msk.f32.vlgmr.msra.gmra.mrb[2].mxu1 %vm283_vm0, %v470_v48 }
 0x3b6   : > { %v844_v50 = vpop.f32.mrb[2].mxu1 }
 0x3b7   : > { %v655_v52 = vadd.f32 %v844_v50, %v575_v49  ;;  %v649_v53 = vpop.f32.mrb[3].mxu1 }
 0x3b8   : > { %v650_v54 = vadd.f32 %v649_v53, %v570_v51 }
 0x3b9   : > { %v659_v55 = vadd.f32 %v655_v52, %v461_v34 }
 0x3ba   : > { %v658_v56 = vadd.f32 %v650_v54, %v460_v35 }
 0x3bb   : > { %v661_v57 = vmax.f32 %v659_v55, 0.0 }
 0x3bc   : > { %v660_v58 = vmax.f32 %v658_v56, 0.0 }
 0x3bd   : > { %664 = vst.msk [vmem:[%s254_s14 + $0x8] sm:$0xff] %vm662_vm1, %v661_v57 }
 0x3be   : > { %663 = vst.msk [vmem:[%s254_s14] sm:$0xff] %vm662_vm1, %v660_v58 }
 0x3bf   : > { %975 = shalt.err (!%p972_p6)
}
 0x3c0   : > { %s976_s27 = scalar_lea.hbm %s1230_s16, 256  ;;  %s980_s12 = scalar_lea.hbm %s1285_s5, 512 }
 0x3c1   : > { %p977_p7 = scmp.ne.s32.totalorder %s1230_s16, %s976_s27  ;;  %p981_p0 = scmp.lt.u32.totalorder %s1230_s16, %s1285_s5 }
 0x3c2   : > { %p982_p2 = scmp.lt.u32.totalorder %s980_s12, %s976_s27  ;;  %p984_p8 = scmp.lt.u32.totalorder %s976_s27, %s1230_s16 }
 0x3c3   : > { %p978_p9 = pnand %p977_p7, %p1297_p10 }
 0x3c4   : > { %p983_p4 = por %p982_p2, %p981_p0 }
 0x3c5   : > { %p979_p12 = pneg %p978_p9 }
 0x3c6   : > { %p985_p11 = por %p984_p8, %p983_p4 }
 0x3c8   : > { %p986_p13 = pnand %p985_p11, %p979_p12 }
 0x3ca   : > { %989 = shalt.err (!%p986_p13)
}
 0x3cb   : > { %s1051_s14 = smov 128   ;;  %s1052_s10 = smov 8  }
 0x3cc   : > { %865 = dma.vmem_to_hbm [thread:$0]  (%p1297_p10), %s1232_s15, 256, %s1230_s16, %s1234_s21, %s1051_s14, %s1051_s14, %s1052_s10  }
 0x3cd PF: > { %p877_p1 = scmp.ge.s32.totalorder %s1044_s23, 2  ;;  %s695_s7 = sand.u32 1, %s1024_s18  }
 0x3ce   : > { %p1298_p3 = scmp.ne.s32.totalorder %s1291_s30, 0  ;;  %s696_s8 = scalar_lea.sflag [#allocation4], %s695_s7 }
 0x3d0   : > { %p872_p5 = pnand %p877_p1, %p1298_p3 }
 0x3d2   : > { %1019 = dma.done.wait (!%p872_p5), %s696_s8, 256  }
 0x3d3   : > { %1021 = vsyncadd (!%p872_p5), %s696_s8, 4294967040  ;;  %s19_s23 = sadd.s32 1, %s1044_s23   ;;  %s1299_s18 = smov %s1028_s19 }
 0x3d4   : > { %p16_p6 = scmp.ge.s32.totalorder %s19_s23, 4   ;;  %s1300_s19 = smov %s1032_s20 }
 0x3d5   : > { %s1301_s20 = smov %s1136_s6  ;;  %s1302_s21 = smov %s1040_s22 }
 0x3d6   : > { %s1303_s22 = smov %s1305_s26  ;;  %18 = sbr.rel (!%p16_p6) target bundleno = 5 (0x5), region = 84 }
 0x3dd   :  { %701 = vsyncpa [#allocation3], 1 }
 0x3de   :  { %703 = vsyncpa [#allocation3 + $0x1], 1 }
 0x3df   :  { %704 = vsyncpa [#allocation4], 1 }
 0x3e0   :  { %706 = vsyncpa [#allocation4 + $0x1], 1 }

</bundles_post_ra>
